<compile_context>
chip_gen: v7x
topology: tpu7x:2x2x1
jax: 0.10.0
libtpu: 0.0.40
codegen_flags: <defaults>
</compile_context>

<pallas_src>
import functools

import jax
import jax.numpy as jnp
from jax.experimental import pallas as pl
from jax.experimental.pallas import tpu as pltpu

_LANE = 128      # lane width: final output dim padded to this (lane-dense vst)
_SUBLANE = 8     # sublane width: batch tiles are multiples of this

_VMEM_BUDGET = 32 * 1024 * 1024   # scoped-VMEM target safe on v5e/v6e/v7x


def _round_up(x, m):
    return ((x + m - 1) // m) * m


# ---------------------------------------------------------------------------
# Kernel
# ---------------------------------------------------------------------------
def _fused_mlp_kernel(*refs, n_layers):
    """refs = (x_ref, w0, b0, w1, b1, ..., w{L-1}, b{L-1}, o_ref).

    Computes o = sigmoid(tanh(... tanh(x @ W0 + b0) ...) @ W_{L-1} + b_{L-1})
    entirely in VMEM.  Matmul operands stay in their native dtype (bf16-native
    MXU on v6e/v7x); accumulation is f32 (preferred_element_type); bias adds and
    activations run in f32.
    """
    x_ref = refs[0]
    o_ref = refs[-1]
    p = refs[1:-1]

    h = x_ref[...]                                      # native dtype into the MXU
    for i in range(n_layers):
        w_ref = p[2 * i]
        b_ref = p[2 * i + 1]
        acc = jnp.dot(h, w_ref[...], preferred_element_type=jnp.float32)
        acc = acc + b_ref[...].astype(jnp.float32)      # (1, N) broadcast, f32
        if i < n_layers - 1:
            # tanh on the EUP; cast back to the next layer's weight dtype so the
            # following matmul also runs at native MXU precision.
            h = jnp.tanh(acc).astype(p[2 * (i + 1)].dtype)
        else:
            # sigmoid(x) = 0.5 * (tanh(x/2) + 1): keeps the epilogue on the EUP
            # slot instead of the VPU divide of the logistic lowering.
            h = 0.5 * (jnp.tanh(0.5 * acc) + 1.0)
    o_ref[...] = h.astype(o_ref.dtype)


# ---------------------------------------------------------------------------
# Tiling / VMEM budgeting
# ---------------------------------------------------------------------------
def _pick_batch_tile(B, dims, itemsize, budget_bytes):
    """Largest multiple-of-8 batch tile (<=1024) whose VMEM footprint fits budget."""
    # Conservative estimate: every feature dim occupies full 128-lane vreg tiles.
    lane = [_round_up(d, _LANE) for d in dims]
    w_bytes = sum(lane[i] * lane[i + 1] for i in range(len(dims) - 1)) * itemsize
    b_bytes = sum(lane[1:]) * _SUBLANE * itemsize        # bias rows pad to 8 sublanes
    fixed = w_bytes + b_bytes                            # VMEM-resident weights/biases
    per_row = 2 * (lane[0] + lane[-1]) * itemsize        # double-buffered in/out tiles
    per_row += max(lane) * itemsize                      # live intermediate activation
    avail = max(budget_bytes - fixed, _SUBLANE * per_row)
    tile = min(1024, _round_up(B, _SUBLANE), avail // per_row)
    return max(_SUBLANE, (tile // _SUBLANE) * _SUBLANE)


# ---------------------------------------------------------------------------
# Forward wrapper
# ---------------------------------------------------------------------------
def manifold_learner_forward(features, padded_params, output_dim, *, batch_tile=None):
    """Fused forward pass of Manifold_learner.

    features:      (B, prod(input_shape)) flattened inputs (unpadded).
    padded_params: flat list [w0, b0, w1, b1, ...] with w: (in, out), b: (1, out).
                   ONLY the last layer's out-dim is pre-padded to 128 — use
                   prepare_params_for_kernel() ONCE at init time, not per call.
    output_dim:    true (unpadded) output width to slice out of the result.
    """
    B, K = features.shape
    n_layers = len(padded_params) // 2
    assert n_layers >= 1 and padded_params[0].shape[0] == K

    dims = [K] + [padded_params[2 * i].shape[1] for i in range(n_layers)]
    itemsize = jnp.dtype(features.dtype).itemsize

    if batch_tile is None:
        batch_tile = _pick_batch_tile(B, dims, itemsize, 3 * _VMEM_BUDGET // 4)
    else:
        batch_tile = max(_SUBLANE, _round_up(int(batch_tile), _SUBLANE))
    B_pad = _round_up(B, batch_tile)

    # Pad batch rows only when needed (no per-call feature/weight padding any more).
    x = features if B_pad == B else jnp.pad(features, ((0, B_pad - B), (0, 0)))

    grid = (B_pad // batch_tile,)
    out_dim_pad = dims[-1]

    # Advisory cost for the XLA scheduler around the fused custom call.
    flops = 2 * B_pad * sum(dims[i] * dims[i + 1] for i in range(n_layers))
    transcendentals = B_pad * sum(dims[1:])
    bytes_accessed = itemsize * (
        B_pad * (dims[0] + out_dim_pad)
        + sum(dims[i] * dims[i + 1] + dims[i + 1] for i in range(n_layers)))

    kernel = functools.partial(_fused_mlp_kernel, n_layers=n_layers)

    def run(single_buffer_weights):
        # Input tile marches over batch; weights/biases use a constant index_map so
        # they are fetched once and stay VMEM-resident across grid iterations.
        in_specs = [pl.BlockSpec((batch_tile, dims[0]), lambda i: (i, 0))]
        for li in range(n_layers):
            w_shape = padded_params[2 * li].shape
            b_shape = padded_params[2 * li + 1].shape
            if single_buffer_weights:
                # Constant blocks don't need double buffering: a single buffer halves
                # their VMEM footprint (matters on v7x's 64 MiB VMEM).
                in_specs.append(pl.BlockSpec(w_shape, lambda i: (0, 0),
                                             pipeline_mode=pl.Buffered(1)))
                in_specs.append(pl.BlockSpec(b_shape, lambda i: (0, 0),
                                             pipeline_mode=pl.Buffered(1)))
            else:
                in_specs.append(pl.BlockSpec(w_shape, lambda i: (0, 0)))
                in_specs.append(pl.BlockSpec(b_shape, lambda i: (0, 0)))
        out_spec = pl.BlockSpec((batch_tile, out_dim_pad), lambda i: (i, 0))

        return pl.pallas_call(
            kernel,
            out_shape=jax.ShapeDtypeStruct((B_pad, out_dim_pad), features.dtype),
            grid=grid,
            in_specs=in_specs,
            out_specs=out_spec,
            compiler_params=pltpu.CompilerParams(
                dimension_semantics=("parallel",),   # batch tiles independent (megacore)
                vmem_limit_bytes=_VMEM_BUDGET,
            ),
            cost_estimate=pl.CostEstimate(
                flops=flops,
                transcendentals=transcendentals,
                bytes_accessed=bytes_accessed,
            ),
        )(x, *padded_params)

    try:
        out_pad = run(single_buffer_weights=True)
    except Exception:
        # Fallback for jax builds that reject pipeline_mode=pl.Buffered(1):
        # use the default double-buffered specs (correctness identical).
        out_pad = run(single_buffer_weights=False)

    # Strip batch padding and the lane padding of the final layer.
    return out_pad[:B, :output_dim]


# ---------------------------------------------------------------------------
# Parameter construction / one-time kernel prep / reference
# ---------------------------------------------------------------------------
def init_manifold_learner_params(key, input_shape, hidden_dims, output_dim,
                                 dtype=jnp.float32):
    """Deterministic synthetic init matching the PyTorch module's parameter shapes.

    PyTorch nn.Linear stores weight as (out, in); we keep (in, out) so the kernel
    computes y = x @ W + b directly on the MXU.
    """
    in_features = 1
    for d in input_shape:
        in_features *= d

    params = []
    dims = [in_features] + list(hidden_dims) + [output_dim]
    for i in range(len(dims) - 1):
        k_in, k_out = dims[i], dims[i + 1]
        key, kw, kb = jax.random.split(key, 3)
        scale = 1.0 / jnp.sqrt(jnp.asarray(k_in, dtype=jnp.float32))
        w = (jax.random.normal(kw, (k_in, k_out), dtype=jnp.float32) * scale).astype(dtype)
        b = (jax.random.normal(kb, (1, k_out), dtype=jnp.float32) * scale).astype(dtype)
        params.append((w, b))
    return params


def prepare_params_for_kernel(params):
    """One-time prep (NOT per forward call): flatten to [w0, b0, ...] and pad ONLY
    the final layer's out-dim (weight columns + bias) to the 128-lane width so the
    kernel's output store is lane-dense.  Returns (flat_padded_params, output_dim).
    """
    flat = []
    for w, b in params[:-1]:
        flat += [w, b]
    w_last, b_last = params[-1]
    out_dim = w_last.shape[1]
    out_pad = _round_up(out_dim, _LANE)
    if out_pad != out_dim:
        w_last = jnp.zeros((w_last.shape[0], out_pad), w_last.dtype).at[:, :out_dim].set(w_last)
        b_last = jnp.zeros((1, out_pad), b_last.dtype).at[:, :out_dim].set(b_last)
    flat += [w_last, b_last]
    return flat, out_dim


def manifold_learner_reference(features, params):
    """Pure-JAX reference for correctness checking."""
    h = features
    n_layers = len(params)
    for i, (w, b) in enumerate(params):
        h = h @ w + b
        h = jax.nn.sigmoid(h) if i == n_layers - 1 else jnp.tanh(h)
    return h


if __name__ == "__main__":
    # Module config consistent with Manifold_learner(input_shape, hidden_dims, output_dim)
    input_shape = (4, 16)          # np.prod(input_shape) = 64 input features
    hidden_dims = [32, 32]
    output_dim = 2
    batch = 8

    key = jax.random.PRNGKey(0)
    key, kx = jax.random.split(key)
    in_features = 1
    for d in input_shape:
        in_features *= d
    # forward() consumes already-flattened features: (batch, prod(input_shape))
    features = jax.random.normal(kx, (batch, in_features), dtype=jnp.float32)

    params = init_manifold_learner_params(key, input_shape, hidden_dims, output_dim)
    padded_params, out_dim = prepare_params_for_kernel(params)   # one-time, hoisted out of the call path

    out = manifold_learner_forward(features, padded_params, out_dim)
    out = jax.block_until_ready(out)

    ref = manifold_learner_reference(features, params)
    assert out.shape == (batch, output_dim), out.shape
    assert jnp.allclose(out, ref, atol=1e-5, rtol=1e-5), "mismatch vs pure-JAX reference"

    print("KERNEL_OK")
</pallas_src>

<mosaic_0001>
module attributes {stable_mosaic.version = 11 : i64} {
  func.func @_fused_mlp_kernel(%arg0: i32, %arg1: memref<8x64xf32, #tpu.memory_space<vmem>>, %arg2: memref<64x32xf32, #tpu.memory_space<vmem>>, %arg3: memref<1x32xf32, #tpu.memory_space<vmem>>, %arg4: memref<32x32xf32, #tpu.memory_space<vmem>>, %arg5: memref<1x32xf32, #tpu.memory_space<vmem>>, %arg6: memref<32x128xf32, #tpu.memory_space<vmem>>, %arg7: memref<1x128xf32, #tpu.memory_space<vmem>>, %arg8: memref<8x128xf32, #tpu.memory_space<vmem>>) attributes {dimension_semantics = [#tpu.dimension_semantics<parallel>], iteration_bounds = array<i64: 1>, scalar_prefetch = 0 : i64, scratch_operands = 0 : i64, tpu.core_type = #tpu.core_type<tc>, window_params = [{transform_indices = @transform_0, window_bounds = array<i64: 8, 64>}, {pipeline_mode = #tpu.pipeline_mode<synchronous>, transform_indices = @transform_1, window_bounds = array<i64: 64, 32>}, {pipeline_mode = #tpu.pipeline_mode<synchronous>, transform_indices = @transform_2, window_bounds = array<i64: 1, 32>}, {pipeline_mode = #tpu.pipeline_mode<synchronous>, transform_indices = @transform_3, window_bounds = array<i64: 32, 32>}, {pipeline_mode = #tpu.pipeline_mode<synchronous>, transform_indices = @transform_4, window_bounds = array<i64: 1, 32>}, {pipeline_mode = #tpu.pipeline_mode<synchronous>, transform_indices = @transform_5, window_bounds = array<i64: 32, 128>}, {pipeline_mode = #tpu.pipeline_mode<synchronous>, transform_indices = @transform_6, window_bounds = array<i64: 1, 128>}, {transform_indices = @transform_7, window_bounds = array<i64: 8, 128>}]} {
    %c0 = arith.constant 0 : index
    %c0_0 = arith.constant 0 : index
    %0 = vector.load %arg1[%c0, %c0_0] : memref<8x64xf32, #tpu.memory_space<vmem>>, vector<8x64xf32>
    %c0_1 = arith.constant 0 : index
    %c0_2 = arith.constant 0 : index
    %1 = vector.load %arg2[%c0_1, %c0_2] : memref<64x32xf32, #tpu.memory_space<vmem>>, vector<64x32xf32>
    %cst = arith.constant dense<0.000000e+00> : vector<8x32xf32>
    %2 = tpu.matmul %0, %1, %cst {dimension_numbers = #tpu.dot_dimension_numbers<[1], [0], [0], [1], [0, 0, 1, 1], [], []>} : vector<8x64xf32>, vector<64x32xf32>, vector<8x32xf32> -> vector<8x32xf32>
    %c0_3 = arith.constant 0 : index
    %c0_4 = arith.constant 0 : index
    %3 = vector.load %arg3[%c0_3, %c0_4] : memref<1x32xf32, #tpu.memory_space<vmem>>, vector<1x32xf32>
    %4 = vector.broadcast %3 : vector<1x32xf32> to vector<8x32xf32>
    %5 = arith.addf %2, %4 : vector<8x32xf32>
    %6 = math.tanh %5 : vector<8x32xf32>
    %c0_5 = arith.constant 0 : index
    %c0_6 = arith.constant 0 : index
    %7 = vector.load %arg4[%c0_5, %c0_6] : memref<32x32xf32, #tpu.memory_space<vmem>>, vector<32x32xf32>
    %cst_7 = arith.constant dense<0.000000e+00> : vector<8x32xf32>
    %8 = tpu.matmul %6, %7, %cst_7 {dimension_numbers = #tpu.dot_dimension_numbers<[1], [0], [0], [1], [0, 0, 1, 1], [], []>} : vector<8x32xf32>, vector<32x32xf32>, vector<8x32xf32> -> vector<8x32xf32>
    %c0_8 = arith.constant 0 : index
    %c0_9 = arith.constant 0 : index
    %9 = vector.load %arg5[%c0_8, %c0_9] : memref<1x32xf32, #tpu.memory_space<vmem>>, vector<1x32xf32>
    %10 = vector.broadcast %9 : vector<1x32xf32> to vector<8x32xf32>
    %11 = arith.addf %8, %10 : vector<8x32xf32>
    %12 = math.tanh %11 : vector<8x32xf32>
    %c0_10 = arith.constant 0 : index
    %c0_11 = arith.constant 0 : index
    %13 = vector.load %arg6[%c0_10, %c0_11] : memref<32x128xf32, #tpu.memory_space<vmem>>, vector<32x128xf32>
    %cst_12 = arith.constant dense<0.000000e+00> : vector<8x128xf32>
    %14 = tpu.matmul %12, %13, %cst_12 {dimension_numbers = #tpu.dot_dimension_numbers<[1], [0], [0], [1], [0, 0, 1, 1], [], []>} : vector<8x32xf32>, vector<32x128xf32>, vector<8x128xf32> -> vector<8x128xf32>
    %c0_13 = arith.constant 0 : index
    %c0_14 = arith.constant 0 : index
    %15 = vector.load %arg7[%c0_13, %c0_14] : memref<1x128xf32, #tpu.memory_space<vmem>>, vector<1x128xf32>
    %16 = vector.broadcast %15 : vector<1x128xf32> to vector<8x128xf32>
    %17 = arith.addf %14, %16 : vector<8x128xf32>
    %cst_15 = arith.constant 5.000000e-01 : f32
    %18 = vector.broadcast %cst_15 : f32 to vector<8x128xf32>
    %19 = arith.mulf %18, %17 : vector<8x128xf32>
    %20 = math.tanh %19 : vector<8x128xf32>
    %cst_16 = arith.constant 1.000000e+00 : f32
    %21 = vector.broadcast %cst_16 : f32 to vector<8x128xf32>
    %22 = arith.addf %20, %21 : vector<8x128xf32>
    %cst_17 = arith.constant 5.000000e-01 : f32
    %23 = vector.broadcast %cst_17 : f32 to vector<8x128xf32>
    %24 = arith.mulf %23, %22 : vector<8x128xf32>
    %c0_18 = arith.constant 0 : index
    %c0_19 = arith.constant 0 : index
    %25 = vector.load %arg8[%c0_18, %c0_19] : memref<8x128xf32, #tpu.memory_space<vmem>>, vector<8x128xf32>
    tpu.vector_store %arg8[%c0_18, %c0_19], %24 {strides = array<i32>} : memref<8x128xf32, #tpu.memory_space<vmem>>, vector<8x128xf32>,
    return
  }
  func.func @transform_0(%arg0: i32) -> (i32, i32) {
    %c0_i32 = arith.constant 0 : i32
    %c0_i32_0 = arith.constant 0 : i32
    return %arg0, %c0_i32 : i32, i32
  }
  func.func @transform_1(%arg0: i32) -> (i32, i32) {
    %c0_i32 = arith.constant 0 : i32
    %c0_i32_0 = arith.constant 0 : i32
    %c0_i32_1 = arith.constant 0 : i32
    return %c0_i32, %c0_i32_0 : i32, i32
  }
  func.func @transform_2(%arg0: i32) -> (i32, i32) {
    %c0_i32 = arith.constant 0 : i32
    %c0_i32_0 = arith.constant 0 : i32
    %c0_i32_1 = arith.constant 0 : i32
    return %c0_i32, %c0_i32_0 : i32, i32
  }
  func.func @transform_3(%arg0: i32) -> (i32, i32) {
    %c0_i32 = arith.constant 0 : i32
    %c0_i32_0 = arith.constant 0 : i32
    %c0_i32_1 = arith.constant 0 : i32
    return %c0_i32, %c0_i32_0 : i32, i32
  }
  func.func @transform_4(%arg0: i32) -> (i32, i32) {
    %c0_i32 = arith.constant 0 : i32
    %c0_i32_0 = arith.constant 0 : i32
    %c0_i32_1 = arith.constant 0 : i32
    return %c0_i32, %c0_i32_0 : i32, i32
  }
  func.func @transform_5(%arg0: i32) -> (i32, i32) {
    %c0_i32 = arith.constant 0 : i32
    %c0_i32_0 = arith.constant 0 : i32
    %c0_i32_1 = arith.constant 0 : i32
    return %c0_i32, %c0_i32_0 : i32, i32
  }
  func.func @transform_6(%arg0: i32) -> (i32, i32) {
    %c0_i32 = arith.constant 0 : i32
    %c0_i32_0 = arith.constant 0 : i32
    %c0_i32_1 = arith.constant 0 : i32
    return %c0_i32, %c0_i32_0 : i32, i32
  }
  func.func @transform_7(%arg0: i32) -> (i32, i32) {
    %c0_i32 = arith.constant 0 : i32
    %c0_i32_0 = arith.constant 0 : i32
    return %arg0, %c0_i32 : i32, i32
  }
}

module attributes {stable_mosaic.version = 11 : i64} {
  func.func @_fused_mlp_kernel(%arg0: i32, %arg1: memref<8x64xf32, #tpu.memory_space<vmem>>, %arg2: memref<64x32xf32, #tpu.memory_space<vmem>>, %arg3: memref<1x32xf32, #tpu.memory_space<vmem>>, %arg4: memref<32x32xf32, #tpu.memory_space<vmem>>, %arg5: memref<1x32xf32, #tpu.memory_space<vmem>>, %arg6: memref<32x128xf32, #tpu.memory_space<vmem>>, %arg7: memref<1x128xf32, #tpu.memory_space<vmem>>, %arg8: memref<8x128xf32, #tpu.memory_space<vmem>>) attributes {dimension_semantics = [#tpu.dimension_semantics<parallel>], iteration_bounds = array<i64: 1>, scalar_prefetch = 0 : i64, scratch_operands = 0 : i64, tpu.core_type = #tpu.core_type<tc>, window_params = [{transform_indices = @transform_0, window_bounds = array<i64: 8, 64>}, {pipeline_mode = #tpu.pipeline_mode<synchronous>, transform_indices = @transform_1, window_bounds = array<i64: 64, 32>}, {pipeline_mode = #tpu.pipeline_mode<synchronous>, transform_indices = @transform_2, window_bounds = array<i64: 1, 32>}, {pipeline_mode = #tpu.pipeline_mode<synchronous>, transform_indices = @transform_3, window_bounds = array<i64: 32, 32>}, {pipeline_mode = #tpu.pipeline_mode<synchronous>, transform_indices = @transform_4, window_bounds = array<i64: 1, 32>}, {pipeline_mode = #tpu.pipeline_mode<synchronous>, transform_indices = @transform_5, window_bounds = array<i64: 32, 128>}, {pipeline_mode = #tpu.pipeline_mode<synchronous>, transform_indices = @transform_6, window_bounds = array<i64: 1, 128>}, {transform_indices = @transform_7, window_bounds = array<i64: 8, 128>}]} {
    %c0 = arith.constant 0 : index
    %c0_0 = arith.constant 0 : index
    %0 = vector.load %arg1[%c0, %c0_0] : memref<8x64xf32, #tpu.memory_space<vmem>>, vector<8x64xf32>
    %c0_1 = arith.constant 0 : index
    %c0_2 = arith.constant 0 : index
    %1 = vector.load %arg2[%c0_1, %c0_2] : memref<64x32xf32, #tpu.memory_space<vmem>>, vector<64x32xf32>
    %cst = arith.constant dense<0.000000e+00> : vector<8x32xf32>
    %2 = tpu.matmul %0, %1, %cst {dimension_numbers = #tpu.dot_dimension_numbers<[1], [0], [0], [1], [0, 0, 1, 1], [], []>} : vector<8x64xf32>, vector<64x32xf32>, vector<8x32xf32> -> vector<8x32xf32>
    %c0_3 = arith.constant 0 : index
    %c0_4 = arith.constant 0 : index
    %3 = vector.load %arg3[%c0_3, %c0_4] : memref<1x32xf32, #tpu.memory_space<vmem>>, vector<1x32xf32>
    %4 = vector.broadcast %3 : vector<1x32xf32> to vector<8x32xf32>
    %5 = arith.addf %2, %4 : vector<8x32xf32>
    %6 = math.tanh %5 : vector<8x32xf32>
    %c0_5 = arith.constant 0 : index
    %c0_6 = arith.constant 0 : index
    %7 = vector.load %arg4[%c0_5, %c0_6] : memref<32x32xf32, #tpu.memory_space<vmem>>, vector<32x32xf32>
    %cst_7 = arith.constant dense<0.000000e+00> : vector<8x32xf32>
    %8 = tpu.matmul %6, %7, %cst_7 {dimension_numbers = #tpu.dot_dimension_numbers<[1], [0], [0], [1], [0, 0, 1, 1], [], []>} : vector<8x32xf32>, vector<32x32xf32>, vector<8x32xf32> -> vector<8x32xf32>
    %c0_8 = arith.constant 0 : index
    %c0_9 = arith.constant 0 : index
    %9 = vector.load %arg5[%c0_8, %c0_9] : memref<1x32xf32, #tpu.memory_space<vmem>>, vector<1x32xf32>
    %10 = vector.broadcast %9 : vector<1x32xf32> to vector<8x32xf32>
    %11 = arith.addf %8, %10 : vector<8x32xf32>
    %12 = math.tanh %11 : vector<8x32xf32>
    %c0_10 = arith.constant 0 : index
    %c0_11 = arith.constant 0 : index
    %13 = vector.load %arg6[%c0_10, %c0_11] : memref<32x128xf32, #tpu.memory_space<vmem>>, vector<32x128xf32>
    %cst_12 = arith.constant dense<0.000000e+00> : vector<8x128xf32>
    %14 = tpu.matmul %12, %13, %cst_12 {dimension_numbers = #tpu.dot_dimension_numbers<[1], [0], [0], [1], [0, 0, 1, 1], [], []>} : vector<8x32xf32>, vector<32x128xf32>, vector<8x128xf32> -> vector<8x128xf32>
    %c0_13 = arith.constant 0 : index
    %c0_14 = arith.constant 0 : index
    %15 = vector.load %arg7[%c0_13, %c0_14] : memref<1x128xf32, #tpu.memory_space<vmem>>, vector<1x128xf32>
    %16 = vector.broadcast %15 : vector<1x128xf32> to vector<8x128xf32>
    %17 = arith.addf %14, %16 : vector<8x128xf32>
    %cst_15 = arith.constant 5.000000e-01 : f32
    %18 = vector.broadcast %cst_15 : f32 to vector<8x128xf32>
    %19 = arith.mulf %18, %17 : vector<8x128xf32>
    %20 = math.tanh %19 : vector<8x128xf32>
    %cst_16 = arith.constant 1.000000e+00 : f32
    %21 = vector.broadcast %cst_16 : f32 to vector<8x128xf32>
    %22 = arith.addf %20, %21 : vector<8x128xf32>
    %cst_17 = arith.constant 5.000000e-01 : f32
    %23 = vector.broadcast %cst_17 : f32 to vector<8x128xf32>
    %24 = arith.mulf %23, %22 : vector<8x128xf32>
    %c0_18 = arith.constant 0 : index
    %c0_19 = arith.constant 0 : index
    %25 = vector.load %arg8[%c0_18, %c0_19] : memref<8x128xf32, #tpu.memory_space<vmem>>, vector<8x128xf32>
    tpu.vector_store %arg8[%c0_18, %c0_19], %24 {strides = array<i32>} : memref<8x128xf32, #tpu.memory_space<vmem>>, vector<8x128xf32>,
    return
  }
  func.func @transform_0(%arg0: i32) -> (i32, i32) {
    %c0_i32 = arith.constant 0 : i32
    %c0_i32_0 = arith.constant 0 : i32
    return %arg0, %c0_i32 : i32, i32
  }
  func.func @transform_1(%arg0: i32) -> (i32, i32) {
    %c0_i32 = arith.constant 0 : i32
    %c0_i32_0 = arith.constant 0 : i32
    %c0_i32_1 = arith.constant 0 : i32
    return %c0_i32, %c0_i32_0 : i32, i32
  }
  func.func @transform_2(%arg0: i32) -> (i32, i32) {
    %c0_i32 = arith.constant 0 : i32
    %c0_i32_0 = arith.constant 0 : i32
    %c0_i32_1 = arith.constant 0 : i32
    return %c0_i32, %c0_i32_0 : i32, i32
  }
  func.func @transform_3(%arg0: i32) -> (i32, i32) {
    %c0_i32 = arith.constant 0 : i32
    %c0_i32_0 = arith.constant 0 : i32
    %c0_i32_1 = arith.constant 0 : i32
    return %c0_i32, %c0_i32_0 : i32, i32
  }
  func.func @transform_4(%arg0: i32) -> (i32, i32) {
    %c0_i32 = arith.constant 0 : i32
    %c0_i32_0 = arith.constant 0 : i32
    %c0_i32_1 = arith.constant 0 : i32
    return %c0_i32, %c0_i32_0 : i32, i32
  }
  func.func @transform_5(%arg0: i32) -> (i32, i32) {
    %c0_i32 = arith.constant 0 : i32
    %c0_i32_0 = arith.constant 0 : i32
    %c0_i32_1 = arith.constant 0 : i32
    return %c0_i32, %c0_i32_0 : i32, i32
  }
  func.func @transform_6(%arg0: i32) -> (i32, i32) {
    %c0_i32 = arith.constant 0 : i32
    %c0_i32_0 = arith.constant 0 : i32
    %c0_i32_1 = arith.constant 0 : i32
    return %c0_i32, %c0_i32_0 : i32, i32
  }
  func.func @transform_7(%arg0: i32) -> (i32, i32) {
    %c0_i32 = arith.constant 0 : i32
    %c0_i32_0 = arith.constant 0 : i32
    return %arg0, %c0_i32 : i32, i32
  }
}

</mosaic_0001>

<bundles_post_ra>
// kernel: tpu_custom_call.1
= control target key start
LH: loop header
LB: loop body
LE: loop exit
PB: predicated region body
PF: predicated region fallthrough
CT: control target
= control target key end

     0   :  { %v431_v3 = vmov 0.0|0.0   ;;  %vm432_vm0 = vmmov 0   ;;  %v433_v6 = vmov 0.0   ;;  %s552_s0 = inlined_call_operand.vmem [shape: f32[8,64], index: 0, kind: input, shape index: {}]   ;;  %s553_s1 = inlined_call_operand.vmem [shape: f32[64,32], index: 1, kind: input, shape index: {}]   ;;  %s554_s2 = inlined_call_operand.vmem [shape: f32[1,32], index: 2, kind: input, shape index: {}]   ;;  %s555_s3 = inlined_call_operand.vmem [shape: f32[32,32], index: 3, kind: input, shape index: {}]   ;;  %s556_s4 = inlined_call_operand.vmem [shape: f32[1,32], index: 4, kind: input, shape index: {}]   ;;  %s557_s5 = inlined_call_operand.vmem [shape: f32[32,128], index: 5, kind: input, shape index: {}]   ;;  %s558_s6 = inlined_call_operand.vmem [shape: f32[1,128], index: 6, kind: input, shape index: {}]   ;;  %s559_s7 = inlined_call_operand.hbm [shape: f32[8,128], index: 7, kind: output, shape index: {}]  }
   0x1   :  { %v28_v0 = vld [vmem:[%s553_s1] sm:$0xff]  ;;  %v29_v1 = vld [vmem:[%s553_s1 + $0x8] sm:$0xff]  ;;  %v30_v2 = vld [vmem:[%s553_s1 + $0x10] sm:$0xff]  ;;  %373 = vmatprep.subr.bf16.mxu0 %v431_v3  ;;  %348 = vmatprep.mubr.msk.f32.mxu0 %vm432_vm0, %v433_v6 }
   0x2   :  { %v374_v4 = vpack.c.bf16 %v29_v1, %v28_v0  ;;  %v31_v5 = vld [vmem:[%s553_s1 + $0x18] sm:$0xff]  ;;  %385 = vmatprep.subr.bf16.mxu1 %v431_v3  ;;  %359 = vmatprep.mubr.msk.f32.mxu1 %vm432_vm0, %v433_v6 }
   0x3   :  { %v377_v7 = vpack.c.bf16 %v31_v5, %v30_v2 }
   0x4   :  { %375 = vmatpush3.bf16.msra.mxu0 %v374_v4 }
   0x5   :  { %12 = vsyncpa [#allocation3], 0  ;;  %376 = vmatprep.subr.bf16.mxu0 %v431_v3  ;;  %v32_v8 = vld [vmem:[%s553_s1 + $0x20] sm:$0xff]  ;;  %v33_v9 = vld [vmem:[%s553_s1 + $0x28] sm:$0xff]  ;;  %vm43_vm1 = vcmask 523264   ;;  %vm129_vm2 = vcmask 261120  }
   0x6   :  { %v380_v10 = vpack.c.bf16 %v33_v9, %v32_v8  ;;  %v34_v11 = vld [vmem:[%s553_s1 + $0x30] sm:$0xff]  ;;  %v35_v12 = vld [vmem:[%s553_s1 + $0x38] sm:$0xff]  ;;  %v27_v14 = vld [vmem:[%s552_s0] sm:$0xff] }
   0x7   :  { %v383_v13 = vpack.c.bf16 %v35_v12, %v34_v11  ;;  %v118_v15 = vld [vmem:[%s555_s3] sm:$0xff]  ;;  %v119_v16 = vld [vmem:[%s555_s3 + $0x8] sm:$0xff]  ;;  %v120_v17 = vld [vmem:[%s555_s3 + $0x10] sm:$0xff] }
   0x8   :  { %378 = vmatpush3.bf16.msra.mxu0 %v377_v7  ;;  %v386_v18 = vpack.c.bf16 %v119_v16, %v118_v15  ;;  %v121_v19 = vld [vmem:[%s555_s3 + $0x18] sm:$0xff]  ;;  %v307_v21 = vld [vmem:[%s554_s2] ss:$0 sm:$0xff]  ;;  %v205_v27 = vld [vmem:[%s557_s5 + $0x8] sm:$0xff] }
   0x9   :  { %379 = vmatprep.subr.bf16.mxu0 %v431_v3  ;;  %v389_v20 = vpack.c.bf16 %v121_v19, %v120_v17  ;;  %v204_v26 = vld [vmem:[%s557_s5] sm:$0xff]  ;;  %v206_v28 = vld [vmem:[%s557_s5 + $0x10] sm:$0xff]  ;;  %v207_v30 = vld [vmem:[%s557_s5 + $0x18] sm:$0xff]  ;;  %s434_s5 = smov [#allocation2]  }
   0xa   :  { %387 = vmatpush3.bf16.msra.mxu1 %v386_v18  ;;  %v392_v29 = vpack.c.bf16 %v205_v27, %v204_v26  ;;  %v395_v31 = vpack.c.bf16 %v207_v30, %v206_v28  ;;  %v309_v32 = vld [vmem:[%s556_s4] ss:$0 sm:$0xff]  ;;  %s299_s14 = sshll.u32 %s434_s5, 4  ;;  %s300_s14 = int_to_ptr.vmem [resolvable:$true] %s299_s14 }
   0xb   :  { %388 = vmatprep.subr.bf16.mxu1 %v431_v3  ;;  %v311_v37 = vld [vmem:[%s558_s6] ss:$0 sm:$0xff]  ;;  %s407_s4 = scalar_lea.vmem %s300_s14, 128  ;;  %p412_p1 = scmp.lt.s32.totalorder %s300_s14, %s300_s14 }
   0xc   :  { %381 = vmatpush3.bf16.msra.mxu0 %v380_v10  ;;  %p408_p0 = scmp.ne.s32.totalorder %s300_s14, %s407_s4  ;;  %p413_p2 = scmp.lt.s32.totalorder %s407_s4, %s407_s4 }
   0xd   :  { %382 = vmatprep.subr.bf16.mxu0 %v431_v3 }
   0xe   :  { %390 = vmatpush3.bf16.msra.mxu1 %v389_v20  ;;  %p414_p3 = por %p413_p2, %p412_p1 }
   0xf   :  { %391 = vmatprep.subr.bf16.mxu1 %v431_v3 }
  0x10   :  { %384 = vmatpush3.bf16.msra.mxu0 %v383_v13  ;;  %p415_p4 = pnand %p414_p3, %p408_p0 }
  0x13   :  { %349 = vmatmul.mubr.msk.f32.vlgmr.msra.gmra.mrb[0].mxu0 %vm43_vm1, %v27_v14 }
  0xe6   :  { %v113_v22 = vpop.f32.mrb[0].mxu0 }
  0xe7   :  { %v114_v23 = vadd.f32 %v307_v21, %v113_v22  ;;  %v350_v24 = vpop.f32.mrb[1].mxu0 }
  0xe9   :  { %401 = vtanh.f32 %v114_v23 }
  0xf3   :  { %v402_v25 = vpop.eup %401 }
  0xf4   :  { %360 = vmatmul.mubr.msk.f32.vlgmr.msra.gmra.mrb[0].mxu1 %vm129_vm2, %v402_v25 }
  0xf5   :  { %370 = vmatprep.mubr.msk.f32.mxu1 %vm432_vm0, %v433_v6  ;;  %393 = vmatpush3.bf16.msra.mxu1 %v392_v29 }
  0xf6   :  { %394 = vmatprep.subr.bf16.mxu1 %v431_v3 }
  0xf9   :  { %396 = vmatpush3.bf16.msra.mxu1 %v395_v31 }
 0x1c7   :  { %v199_v33 = vpop.f32.mrb[0].mxu1 }
 0x1c8   :  { %v200_v34 = vadd.f32 %v309_v32, %v199_v33  ;;  %v361_v35 = vpop.f32.mrb[1].mxu1 }
 0x1ca   :  { %403 = vtanh.f32 %v200_v34 }
 0x1d4   :  { %v404_v36 = vpop.eup %403 }
 0x1d5   :  { %371 = vmatmul.mubr.msk.f32.vlgmr.msra.gmra.mrb[2].mxu1 %vm129_vm2, %v404_v36 }
 0x2a8   :  { %v284_v38 = vpop.f32.mrb[2].mxu1 }
 0x2a9   :  { %v285_v39 = vadd.f32 %v311_v37, %v284_v38  ;;  %v372_v40 = vpop.f32.mrb[3].mxu1 }
 0x2ab   :  { %v288_v41 = vmul.f32 0.5, %v285_v39 }
 0x2ad   :  { %405 = vtanh.f32 %v288_v41 }
 0x2b7   :  { %v406_v42 = vpop.eup %405 }
 0x2b8   :  { %v290_v43 = vadd.f32 1.0, %v406_v42 }
 0x2ba   :  { %v291_v44 = vmul.f32 0.5, %v290_v43 }
 0x2bc   :  { %292 = vst [vmem:[#allocation2] sm:$0xff] %v291_v44 }
 0x2bd   :  { %418 = shalt.err (!%p415_p4)
}
 0x2be   :  { %s419_s16 = scalar_lea.hbm %s559_s7, 128 }
 0x2bf   :  { %p420_p5 = scmp.ne.s32.totalorder %s559_s7, %s419_s16  ;;  %p423_p6 = scmp.lt.u32.totalorder %s419_s16, %s559_s7 }
 0x2c1   :  { %p425_p7 = pnand %p423_p6, %p420_p5 }
 0x2c3   :  { %428 = shalt.err (!%p425_p7)
}
 0x2c4   :  { %302 = dma.vmem_to_hbm [thread:$0]  %s300_s14, 128, %s559_s7, [#allocation3]  }
 0x2c5   :  { %429 = dma.done.wait [#allocation3], 128  }
 0x2c6   :  { %430 = vsyncadd [#allocation3], 4294967168 }
 0x2c7   :  { %306 = vsyncpa [#allocation3], 1 }

// kernel: tpu_custom_call.1
= control target key start
LH: loop header
LB: loop body
LE: loop exit
PB: predicated region body
PF: predicated region fallthrough
CT: control target
= control target key end

     0   :  { %v431_v3 = vmov 0.0|0.0   ;;  %vm432_vm0 = vmmov 0   ;;  %v433_v6 = vmov 0.0   ;;  %s552_s0 = inlined_call_operand.vmem [shape: f32[8,64], index: 0, kind: input, shape index: {}]   ;;  %s553_s1 = inlined_call_operand.vmem [shape: f32[64,32], index: 1, kind: input, shape index: {}]   ;;  %s554_s2 = inlined_call_operand.vmem [shape: f32[1,32], index: 2, kind: input, shape index: {}]   ;;  %s555_s3 = inlined_call_operand.vmem [shape: f32[32,32], index: 3, kind: input, shape index: {}]   ;;  %s556_s4 = inlined_call_operand.vmem [shape: f32[1,32], index: 4, kind: input, shape index: {}]   ;;  %s557_s5 = inlined_call_operand.vmem [shape: f32[32,128], index: 5, kind: input, shape index: {}]   ;;  %s558_s6 = inlined_call_operand.vmem [shape: f32[1,128], index: 6, kind: input, shape index: {}]   ;;  %s559_s7 = inlined_call_operand.hbm [shape: f32[8,128], index: 7, kind: output, shape index: {}]  }
   0x1   :  { %v28_v0 = vld [vmem:[%s553_s1] sm:$0xff]  ;;  %v29_v1 = vld [vmem:[%s553_s1 + $0x8] sm:$0xff]  ;;  %v30_v2 = vld [vmem:[%s553_s1 + $0x10] sm:$0xff]  ;;  %373 = vmatprep.subr.bf16.mxu0 %v431_v3  ;;  %348 = vmatprep.mubr.msk.f32.mxu0 %vm432_vm0, %v433_v6 }
   0x2   :  { %v374_v4 = vpack.c.bf16 %v29_v1, %v28_v0  ;;  %v31_v5 = vld [vmem:[%s553_s1 + $0x18] sm:$0xff]  ;;  %385 = vmatprep.subr.bf16.mxu1 %v431_v3  ;;  %359 = vmatprep.mubr.msk.f32.mxu1 %vm432_vm0, %v433_v6 }
   0x3   :  { %v377_v7 = vpack.c.bf16 %v31_v5, %v30_v2 }
   0x4   :  { %375 = vmatpush3.bf16.msra.mxu0 %v374_v4 }
   0x5   :  { %12 = vsyncpa [#allocation3], 0  ;;  %376 = vmatprep.subr.bf16.mxu0 %v431_v3  ;;  %v32_v8 = vld [vmem:[%s553_s1 + $0x20] sm:$0xff]  ;;  %v33_v9 = vld [vmem:[%s553_s1 + $0x28] sm:$0xff]  ;;  %vm43_vm1 = vcmask 523264   ;;  %vm129_vm2 = vcmask 261120  }
   0x6   :  { %v380_v10 = vpack.c.bf16 %v33_v9, %v32_v8  ;;  %v34_v11 = vld [vmem:[%s553_s1 + $0x30] sm:$0xff]  ;;  %v35_v12 = vld [vmem:[%s553_s1 + $0x38] sm:$0xff]  ;;  %v27_v14 = vld [vmem:[%s552_s0] sm:$0xff] }
   0x7   :  { %v383_v13 = vpack.c.bf16 %v35_v12, %v34_v11  ;;  %v118_v15 = vld [vmem:[%s555_s3] sm:$0xff]  ;;  %v119_v16 = vld [vmem:[%s555_s3 + $0x8] sm:$0xff]  ;;  %v120_v17 = vld [vmem:[%s555_s3 + $0x10] sm:$0xff] }
   0x8   :  { %378 = vmatpush3.bf16.msra.mxu0 %v377_v7  ;;  %v386_v18 = vpack.c.bf16 %v119_v16, %v118_v15  ;;  %v121_v19 = vld [vmem:[%s555_s3 + $0x18] sm:$0xff]  ;;  %v307_v21 = vld [vmem:[%s554_s2] ss:$0 sm:$0xff]  ;;  %v205_v27 = vld [vmem:[%s557_s5 + $0x8] sm:$0xff] }
   0x9   :  { %379 = vmatprep.subr.bf16.mxu0 %v431_v3  ;;  %v389_v20 = vpack.c.bf16 %v121_v19, %v120_v17  ;;  %v204_v26 = vld [vmem:[%s557_s5] sm:$0xff]  ;;  %v206_v28 = vld [vmem:[%s557_s5 + $0x10] sm:$0xff]  ;;  %v207_v30 = vld [vmem:[%s557_s5 + $0x18] sm:$0xff]  ;;  %s434_s5 = smov [#allocation2]  }
   0xa   :  { %387 = vmatpush3.bf16.msra.mxu1 %v386_v18  ;;  %v392_v29 = vpack.c.bf16 %v205_v27, %v204_v26  ;;  %v395_v31 = vpack.c.bf16 %v207_v30, %v206_v28  ;;  %v309_v32 = vld [vmem:[%s556_s4] ss:$0 sm:$0xff]  ;;  %s299_s14 = sshll.u32 %s434_s5, 4  ;;  %s300_s14 = int_to_ptr.vmem [resolvable:$true] %s299_s14 }
   0xb   :  { %388 = vmatprep.subr.bf16.mxu1 %v431_v3  ;;  %v311_v37 = vld [vmem:[%s558_s6] ss:$0 sm:$0xff]  ;;  %s407_s4 = scalar_lea.vmem %s300_s14, 128  ;;  %p412_p1 = scmp.lt.s32.totalorder %s300_s14, %s300_s14 }
   0xc   :  { %381 = vmatpush3.bf16.msra.mxu0 %v380_v10  ;;  %p408_p0 = scmp.ne.s32.totalorder %s300_s14, %s407_s4  ;;  %p413_p2 = scmp.lt.s32.totalorder %s407_s4, %s407_s4 }
   0xd   :  { %382 = vmatprep.subr.bf16.mxu0 %v431_v3 }
   0xe   :  { %390 = vmatpush3.bf16.msra.mxu1 %v389_v20  ;;  %p414_p3 = por %p413_p2, %p412_p1 }
   0xf   :  { %391 = vmatprep.subr.bf16.mxu1 %v431_v3 }
  0x10   :  { %384 = vmatpush3.bf16.msra.mxu0 %v383_v13  ;;  %p415_p4 = pnand %p414_p3, %p408_p0 }
  0x13   :  { %349 = vmatmul.mubr.msk.f32.vlgmr.msra.gmra.mrb[0].mxu0 %vm43_vm1, %v27_v14 }
  0xe6   :  { %v113_v22 = vpop.f32.mrb[0].mxu0 }
  0xe7   :  { %v114_v23 = vadd.f32 %v307_v21, %v113_v22  ;;  %v350_v24 = vpop.f32.mrb[1].mxu0 }
  0xe9   :  { %401 = vtanh.f32 %v114_v23 }
  0xf3   :  { %v402_v25 = vpop.eup %401 }
  0xf4   :  { %360 = vmatmul.mubr.msk.f32.vlgmr.msra.gmra.mrb[0].mxu1 %vm129_vm2, %v402_v25 }
  0xf5   :  { %370 = vmatprep.mubr.msk.f32.mxu1 %vm432_vm0, %v433_v6  ;;  %393 = vmatpush3.bf16.msra.mxu1 %v392_v29 }
  0xf6   :  { %394 = vmatprep.subr.bf16.mxu1 %v431_v3 }
  0xf9   :  { %396 = vmatpush3.bf16.msra.mxu1 %v395_v31 }
 0x1c7   :  { %v199_v33 = vpop.f32.mrb[0].mxu1 }
 0x1c8   :  { %v200_v34 = vadd.f32 %v309_v32, %v199_v33  ;;  %v361_v35 = vpop.f32.mrb[1].mxu1 }
 0x1ca   :  { %403 = vtanh.f32 %v200_v34 }
 0x1d4   :  { %v404_v36 = vpop.eup %403 }
 0x1d5   :  { %371 = vmatmul.mubr.msk.f32.vlgmr.msra.gmra.mrb[2].mxu1 %vm129_vm2, %v404_v36 }
 0x2a8   :  { %v284_v38 = vpop.f32.mrb[2].mxu1 }
 0x2a9   :  { %v285_v39 = vadd.f32 %v311_v37, %v284_v38  ;;  %v372_v40 = vpop.f32.mrb[3].mxu1 }
 0x2ab   :  { %v288_v41 = vmul.f32 0.5, %v285_v39 }
 0x2ad   :  { %405 = vtanh.f32 %v288_v41 }
 0x2b7   :  { %v406_v42 = vpop.eup %405 }
 0x2b8   :  { %v290_v43 = vadd.f32 1.0, %v406_v42 }
 0x2ba   :  { %v291_v44 = vmul.f32 0.5, %v290_v43 }
 0x2bc   :  { %292 = vst [vmem:[#allocation2] sm:$0xff] %v291_v44 }
 0x2bd   :  { %418 = shalt.err (!%p415_p4)
}
 0x2be   :  { %s419_s16 = scalar_lea.hbm %s559_s7, 128 }
 0x2bf   :  { %p420_p5 = scmp.ne.s32.totalorder %s559_s7, %s419_s16  ;;  %p423_p6 = scmp.lt.u32.totalorder %s419_s16, %s559_s7 }
 0x2c1   :  { %p425_p7 = pnand %p423_p6, %p420_p5 }
 0x2c3   :  { %428 = shalt.err (!%p425_p7)
}
 0x2c4   :  { %302 = dma.vmem_to_hbm [thread:$0]  %s300_s14, 128, %s559_s7, [#allocation3]  }
 0x2c5   :  { %429 = dma.done.wait [#allocation3], 128  }
 0x2c6   :  { %430 = vsyncadd [#allocation3], 4294967168 }
 0x2c7   :  { %306 = vsyncpa [#allocation3], 1 }

</bundles_post_ra>
